<compile_context>
chip_gen: v7x
topology: tpu7x:2x2x1
jax: 0.10.0
libtpu: 0.0.40
codegen_flags: <defaults>
</compile_context>

<pallas_src>
import functools
import math

import jax
import jax.numpy as jnp
from jax.experimental import pallas as pl
from jax.experimental.pallas import tpu as pltpu


def _conv1d_block_kernel(x_ref, w_ref, b_ref, g_ref, be_ref, seg_ref, exp_ref,
                         gsum_ref, gbc_ref, o_ref, *, K, pad, L, eps):
    # x_ref   : (R, Cin)        R = Bt*L rows (Bt samples, sample-major), matmul dtype
    # w_ref   : (K, Cin, Cout)  per-tap conv weights, matmul dtype
    # b_ref   : (1, Cout)       conv bias (f32)
    # g_ref   : (1, Cout)       GroupNorm gamma (f32)
    # be_ref  : (1, Cout)       GroupNorm beta (f32)
    # seg_ref : (Bt, R)         segment-sum matrix (rows of sample b -> row b)
    # exp_ref : (R, Bt)         per-sample -> per-row broadcast matrix
    # gsum_ref: (Cout, G)       group pooling (already scaled by 1/(L*Cg))
    # gbc_ref : (G, Cout)       group -> channel broadcast
    # o_ref   : (R, Cout)       output block (f32)
    R = x_ref.shape[0]
    Cout = o_ref.shape[-1]
    mm_dtype = w_ref.dtype

    xf = x_ref[...].astype(jnp.float32)                       # (R, Cin)
    pos = jax.lax.broadcasted_iota(jnp.int32, (R, 1), 0) % L  # row index within sample

    # --- Conv1d: K per-tap MXU matmuls, halo built in-VMEM (roll + mask) ---
    acc = jnp.zeros((R, Cout), jnp.float32)
    for k in range(K):
        s = k - pad                                   # temporal offset of tap k
        if s == 0:
            xk = xf
        else:
            xk = pltpu.roll(xf, shift=(-s) % R, axis=0)        # xk[r] = x[r + s]
            valid = jnp.logical_and(pos + s >= 0, pos + s < L)  # stay inside sample
            xk = jnp.where(valid, xk, 0.0)
        acc = acc + jnp.dot(xk.astype(mm_dtype), w_ref[k],
                            preferred_element_type=jnp.float32)
    y = acc + b_ref[...]                                       # (R, Cout), f32

    # --- GroupNorm: per-(sample, group) stats via small pooling matmuls ---
    ssum = jnp.dot(seg_ref[...], y, preferred_element_type=jnp.float32)      # (Bt, Cout)
    sqs = jnp.dot(seg_ref[...], y * y, preferred_element_type=jnp.float32)   # (Bt, Cout)
    mean_g = jnp.dot(ssum, gsum_ref[...], preferred_element_type=jnp.float32)  # (Bt, G)
    ex2_g = jnp.dot(sqs, gsum_ref[...], preferred_element_type=jnp.float32)    # (Bt, G)
    var_g = jnp.maximum(ex2_g - mean_g * mean_g, 0.0)
    inv_g = jax.lax.rsqrt(var_g + eps)
    mean_c = jnp.dot(mean_g, gbc_ref[...], preferred_element_type=jnp.float32)  # (Bt, Cout)
    inv_c = jnp.dot(inv_g, gbc_ref[...], preferred_element_type=jnp.float32)    # (Bt, Cout)

    # Pre-fold scale/shift so normalisation is one mul + one add per element.
    scale = inv_c * g_ref[...]                                  # (Bt, Cout)
    shift = be_ref[...] - mean_c * scale                        # (Bt, Cout)
    scale_r = jnp.dot(exp_ref[...], scale, preferred_element_type=jnp.float32)  # (R, Cout)
    shift_r = jnp.dot(exp_ref[...], shift, preferred_element_type=jnp.float32)  # (R, Cout)
    yn = y * scale_r + shift_r

    # --- Mish: x * tanh(softplus(x)), f32 on VPU/EUP ---
    out = yn * jnp.tanh(jax.nn.softplus(yn))
    o_ref[...] = out.astype(o_ref.dtype)


def conv1d_block(x_ncl, conv_w, conv_b, gn_w, gn_b, *, n_groups=8, eps=1e-5,
                 matmul_dtype=None, batch_tile=None):
    """Conv1dBlock forward.

    x_ncl  : (N, Cin, L)    float32  (PyTorch NCL layout)
    conv_w : (Cout, Cin, K) float32  (PyTorch Conv1d weight)
    conv_b : (Cout,)        float32
    gn_w   : (Cout,)        float32  (GroupNorm gamma)
    gn_b   : (Cout,)        float32  (GroupNorm beta)
    matmul_dtype : None -> use x dtype for MXU operands (faithful f32 math);
                   jnp.bfloat16 -> bf16 MXU operands with f32 accumulation
                   (fast path on v6e/v7x, stats remain f32).
    returns (N, Cout, L)    float32
    """
    N, Cin, L = x_ncl.shape
    Cout, Cin_w, K = conv_w.shape
    assert Cin_w == Cin
    # TODO(synk): even kernel_size (PyTorch padding=k//2 gives length L+1) is not
    # handled; the diffusion Conv1dBlock uses odd kernel sizes (3 / 5).
    assert K % 2 == 1, "only odd kernel_size supported"
    pad = K // 2
    G = n_groups
    assert Cout % G == 0, "out_channels must be divisible by n_groups"
    Cg = Cout // G

    mm_dtype = jnp.dtype(matmul_dtype) if matmul_dtype is not None else jnp.dtype(x_ncl.dtype)
    mmb = mm_dtype.itemsize

    # --- generation-aware VMEM budget (v5e/v6e 128 MiB, v7x 64 MiB per TC) ---
    try:
        cap = int(getattr(pltpu.get_tpu_info(), "vmem_capacity_bytes", 0)) or (64 << 20)
    except Exception:
        cap = 64 << 20
    vmem_limit = int(0.85 * cap)

    # --- batch tile Bt: fold Bt*L rows into the conv matmul M dimension ---
    q = 8 // math.gcd(L, 8)          # Bt multiple of q  =>  Bt*L % 8 == 0 (sublane tile)

    def est_bytes(bt):
        r = bt * L
        return (2 * r * Cin * mmb                      # input block (double-buffered)
                + 2 * r * Cout * 4                     # output block (double-buffered)
                + 2 * (K * Cin * Cout * mmb            # resident tap weights
                       + 2 * r * bt * 4                # segment / expand matrices
                       + 2 * Cout * G * 4 + 3 * Cout * 4)
                + (6 * r * Cout + 3 * r * Cin) * 4)    # in-kernel f32 temporaries

    Bt = -(-512 // L) if batch_tile is None else int(batch_tile)   # ~512 rows/step
    Bt = -(-Bt // q) * q
    Bt = min(Bt, -(-N // q) * q)
    while Bt > q and est_bytes(Bt) > 0.4 * vmem_limit:
        Bt -= q
    Bt = max(Bt, q)
    Npad = -(-N // Bt) * Bt
    R = Bt * L

    # --- host-side prep: layout only (no halo pad of the activation in HBM) ---
    x_nlc = jnp.transpose(x_ncl, (0, 2, 1))                     # NCL -> NLC
    if Npad != N:
        x_nlc = jnp.pad(x_nlc, ((0, Npad - N), (0, 0), (0, 0)))  # batch round-up only
    x2 = x_nlc.reshape(Npad * L, Cin).astype(mm_dtype)           # (Npad*L, Cin)

    w_taps = jnp.transpose(conv_w, (2, 1, 0)).astype(mm_dtype)   # (K, Cin, Cout)
    b2 = conv_b.reshape(1, Cout).astype(jnp.float32)
    g2 = gn_w.reshape(1, Cout).astype(jnp.float32)
    be2 = gn_b.reshape(1, Cout).astype(jnp.float32)

    samp = jnp.arange(R, dtype=jnp.int32) // L
    seg = (samp[None, :] == jnp.arange(Bt, dtype=jnp.int32)[:, None]).astype(jnp.float32)  # (Bt, R)
    expand = seg.T                                                                          # (R, Bt)
    cid = jnp.arange(Cout, dtype=jnp.int32) // Cg
    gsum = (cid[:, None] == jnp.arange(G, dtype=jnp.int32)[None, :]).astype(jnp.float32) \
        / float(L * Cg)                                                                     # (Cout, G)
    gbc = (cid[None, :] == jnp.arange(G, dtype=jnp.int32)[:, None]).astype(jnp.float32)     # (G, Cout)

    kern = functools.partial(_conv1d_block_kernel, K=K, pad=pad, L=L, eps=float(eps))

    out2 = pl.pallas_call(
        kern,
        out_shape=jax.ShapeDtypeStruct((Npad * L, Cout), jnp.float32),
        grid_spec=pltpu.PrefetchScalarGridSpec(
            num_scalar_prefetch=0,
            grid=(Npad // Bt,),
            in_specs=[
                pl.BlockSpec((R, Cin), lambda n: (n, 0)),
                # Resident operands (constant index_map -> stay in VMEM across steps).
                # TODO(synk): pipeline_mode=pl.Buffered(1) on these would drop their
                # second buffer copy (worth ~K*Cin*Cout*itemsize on v7x's 64 MiB).
                pl.BlockSpec((K, Cin, Cout), lambda n: (0, 0, 0)),
                pl.BlockSpec((1, Cout), lambda n: (0, 0)),
                pl.BlockSpec((1, Cout), lambda n: (0, 0)),
                pl.BlockSpec((1, Cout), lambda n: (0, 0)),
                pl.BlockSpec((Bt, R), lambda n: (0, 0)),
                pl.BlockSpec((R, Bt), lambda n: (0, 0)),
                pl.BlockSpec((Cout, G), lambda n: (0, 0)),
                pl.BlockSpec((G, Cout), lambda n: (0, 0)),
            ],
            # Lane-dense (unmasked) stores whenever Cout is a multiple of 128,
            # which holds at production channel counts (256/512/1024).
            out_specs=pl.BlockSpec((R, Cout), lambda n: (n, 0)),
        ),
        compiler_params=pltpu.CompilerParams(
            dimension_semantics=("parallel",),
            vmem_limit_bytes=vmem_limit,
        ),
    )(x2, w_taps, b2, g2, be2, seg, expand, gsum, gbc)

    out = out2.reshape(Npad, L, Cout)[:N]
    # NLC -> NCL at the module boundary (elidable if the model stays channels-last).
    return jnp.transpose(out, (0, 2, 1))


def _reference_conv1d_block(x, w, b, gamma, beta, *, n_groups=8, eps=1e-5):
    """Pure-JAX reference: Conv1d(pad=k//2) -> GroupNorm -> Mish."""
    pad = w.shape[-1] // 2
    y = jax.lax.conv_general_dilated(
        x, w, window_strides=(1,), padding=[(pad, pad)],
        dimension_numbers=("NCH", "OIH", "NCH"),
        precision=jax.lax.Precision.HIGHEST)
    y = y + b[None, :, None]
    N, C, Lo = y.shape
    G = n_groups
    yg = y.reshape(N, G, C // G, Lo)
    mean = yg.mean(axis=(2, 3), keepdims=True)
    var = yg.var(axis=(2, 3), keepdims=True)
    yn = ((yg - mean) / jnp.sqrt(var + eps)).reshape(N, C, Lo)
    yn = yn * gamma[None, :, None] + beta[None, :, None]
    return yn * jnp.tanh(jax.nn.softplus(yn))


if __name__ == "__main__":
    key = jax.random.PRNGKey(0)

    # --- config 1: module-default shapes (single grid step) ---
    k1, k2, k3, k4, k5 = jax.random.split(key, 5)
    N, Cin, Cout, L, K, G = 2, 16, 32, 16, 5, 8
    x = jax.random.normal(k1, (N, Cin, L), dtype=jnp.float32)
    conv_w = jax.random.normal(k2, (Cout, Cin, K), dtype=jnp.float32) * 0.1
    conv_b = jax.random.normal(k3, (Cout,), dtype=jnp.float32) * 0.1
    gn_w = 1.0 + 0.1 * jax.random.normal(k4, (Cout,), dtype=jnp.float32)
    gn_b = 0.1 * jax.random.normal(k5, (Cout,), dtype=jnp.float32)

    ref = _reference_conv1d_block(x, conv_w, conv_b, gn_w, gn_b, n_groups=G)

    out = jax.block_until_ready(
        conv1d_block(x, conv_w, conv_b, gn_w, gn_b, n_groups=G))
    assert out.shape == (N, Cout, L), out.shape
    err = float(jnp.max(jnp.abs(out - ref)))
    assert jnp.allclose(out, ref, atol=1e-3, rtol=1e-3), f"f32 path max err {err}"

    # bf16 MXU-operand fast path (f32 accumulation / stats).
    out_bf = jax.block_until_ready(
        conv1d_block(x, conv_w, conv_b, gn_w, gn_b, n_groups=G,
                     matmul_dtype=jnp.bfloat16))
    err_bf = float(jnp.max(jnp.abs(out_bf - ref)))
    assert jnp.allclose(out_bf, ref, atol=5e-2, rtol=5e-2), f"bf16 path max err {err_bf}"

    # --- config 2: ragged batch (N % Bt != 0), multi-step grid, K=3 ---
    j1, j2, j3, j4, j5 = jax.random.split(jax.random.PRNGKey(1), 5)
    N2, Ci2, Co2, L2, K2, G2 = 5, 8, 16, 12, 3, 4
    x2 = jax.random.normal(j1, (N2, Ci2, L2), dtype=jnp.float32)
    w2 = jax.random.normal(j2, (Co2, Ci2, K2), dtype=jnp.float32) * 0.1
    b2 = jax.random.normal(j3, (Co2,), dtype=jnp.float32) * 0.1
    gw2 = 1.0 + 0.1 * jax.random.normal(j4, (Co2,), dtype=jnp.float32)
    gb2 = 0.1 * jax.random.normal(j5, (Co2,), dtype=jnp.float32)

    ref2 = _reference_conv1d_block(x2, w2, b2, gw2, gb2, n_groups=G2)
    out2 = jax.block_until_ready(
        conv1d_block(x2, w2, b2, gw2, gb2, n_groups=G2, batch_tile=2))
    assert out2.shape == (N2, Co2, L2), out2.shape
    err2 = float(jnp.max(jnp.abs(out2 - ref2)))
    assert jnp.allclose(out2, ref2, atol=1e-3, rtol=1e-3), f"cfg2 max err {err2}"

    print("KERNEL_OK")
</pallas_src>

<mosaic_0001>
module attributes {stable_mosaic.version = 11 : i64} {
  func.func @_conv1d_block_kernel(%arg0: i32, %arg1: memref<32x16xf32, #tpu.memory_space<vmem>>, %arg2: memref<5x16x32xf32, #tpu.memory_space<vmem>>, %arg3: memref<1x32xf32, #tpu.memory_space<vmem>>, %arg4: memref<1x32xf32, #tpu.memory_space<vmem>>, %arg5: memref<1x32xf32, #tpu.memory_space<vmem>>, %arg6: memref<2x32xf32, #tpu.memory_space<vmem>>, %arg7: memref<32x2xf32, #tpu.memory_space<vmem>>, %arg8: memref<32x8xf32, #tpu.memory_space<vmem>>, %arg9: memref<8x32xf32, #tpu.memory_space<vmem>>, %arg10: memref<32x32xf32, #tpu.memory_space<vmem>>) attributes {dimension_semantics = [#tpu.dimension_semantics<parallel>], iteration_bounds = array<i64: 1>, scalar_prefetch = 0 : i64, scratch_operands = 0 : i64, tpu.core_type = #tpu.core_type<tc>, window_params = [{transform_indices = @transform_0, window_bounds = array<i64: 32, 16>}, {pipeline_mode = #tpu.pipeline_mode<synchronous>, transform_indices = @transform_1, window_bounds = array<i64: 5, 16, 32>}, {pipeline_mode = #tpu.pipeline_mode<synchronous>, transform_indices = @transform_2, window_bounds = array<i64: 1, 32>}, {pipeline_mode = #tpu.pipeline_mode<synchronous>, transform_indices = @transform_3, window_bounds = array<i64: 1, 32>}, {pipeline_mode = #tpu.pipeline_mode<synchronous>, transform_indices = @transform_4, window_bounds = array<i64: 1, 32>}, {pipeline_mode = #tpu.pipeline_mode<synchronous>, transform_indices = @transform_5, window_bounds = array<i64: 2, 32>}, {pipeline_mode = #tpu.pipeline_mode<synchronous>, transform_indices = @transform_6, window_bounds = array<i64: 32, 2>}, {pipeline_mode = #tpu.pipeline_mode<synchronous>, transform_indices = @transform_7, window_bounds = array<i64: 32, 8>}, {pipeline_mode = #tpu.pipeline_mode<synchronous>, transform_indices = @transform_8, window_bounds = array<i64: 8, 32>}, {transform_indices = @transform_9, window_bounds = array<i64: 32, 32>}]} {
    %c0 = arith.constant 0 : index
    %c0_0 = arith.constant 0 : index
    %0 = vector.load %arg1[%c0, %c0_0] : memref<32x16xf32, #tpu.memory_space<vmem>>, vector<32x16xf32>
    %1 = tpu.iota {dimensions = array<i32: 0>} : vector<32x1xi32>
    %c16_i32 = arith.constant 16 : i32
    %c0_i32 = arith.constant 0 : i32
    %2 = arith.cmpi eq, %c16_i32, %c0_i32 : i32
    %c1_i32 = arith.constant 1 : i32
    %3 = arith.select %2, %c1_i32, %c16_i32 : i32
    %4 = vector.broadcast %3 : i32 to vector<32x1xi32>
    %5 = arith.remsi %1, %4 : vector<32x1xi32>
    %c0_i32_1 = arith.constant 0 : i32
    %6 = vector.broadcast %c0_i32_1 : i32 to vector<32x1xi32>
    %7 = arith.cmpi ne, %5, %6 : vector<32x1xi32>
    %c0_i32_2 = arith.constant 0 : i32
    %8 = vector.broadcast %c0_i32_2 : i32 to vector<32x1xi32>
    %9 = arith.cmpi slt, %5, %8 : vector<32x1xi32>
    %c0_i32_3 = arith.constant 0 : i32
    %10 = arith.cmpi slt, %3, %c0_i32_3 : i32
    %11 = vector.broadcast %10 : i1 to vector<32x1xi1>
    %12 = vector.broadcast %11 : vector<32x1xi1> to vector<32x1xi1>
    %13 = arith.xori %9, %12 : vector<32x1xi1>
    %14 = arith.andi %13, %7 : vector<32x1xi1>
    %15 = vector.broadcast %3 : i32 to vector<32x1xi32>
    %16 = arith.addi %5, %15 : vector<32x1xi32>
    %17 = arith.select %14, %16, %5 : vector<32x1xi1>, vector<32x1xi32>
    %cst = arith.constant 0.000000e+00 : f32
    %18 = vector.broadcast %cst : f32 to vector<32x32xf32>
    %c2_i32 = arith.constant 2 : i32
    %19 = tpu.dynamic_rotate %0 by %c2_i32 dim 0 : vector<32x16xf32>, i32 -> vector<32x16xf32>
    %c-2_i32 = arith.constant -2 : i32
    %20 = vector.broadcast %c-2_i32 : i32 to vector<32x1xi32>
    %21 = arith.addi %17, %20 : vector<32x1xi32>
    %c0_i32_4 = arith.constant 0 : i32
    %22 = vector.broadcast %c0_i32_4 : i32 to vector<32x1xi32>
    %23 = arith.cmpi sge, %21, %22 : vector<32x1xi32>
    %c-2_i32_5 = arith.constant -2 : i32
    %24 = vector.broadcast %c-2_i32_5 : i32 to vector<32x1xi32>
    %25 = arith.addi %17, %24 : vector<32x1xi32>
    %c16_i32_6 = arith.constant 16 : i32
    %26 = vector.broadcast %c16_i32_6 : i32 to vector<32x1xi32>
    %27 = arith.cmpi slt, %25, %26 : vector<32x1xi32>
    %28 = arith.andi %23, %27 : vector<32x1xi1>
    %cst_7 = arith.constant 0.000000e+00 : f32
    %29 = vector.shape_cast %28 : vector<32x1xi1> to vector<32x1xi1>
    %30 = vector.broadcast %29 : vector<32x1xi1> to vector<32x16xi1>
    %31 = vector.broadcast %cst_7 : f32 to vector<32x16xf32>
    %32 = arith.select %30, %19, %31 : vector<32x16xi1>, vector<32x16xf32>
    %c0_8 = arith.constant 0 : index
    %c0_9 = arith.constant 0 : index
    %c0_10 = arith.constant 0 : index
    %33 = vector.load %arg2[%c0_8, %c0_9, %c0_10] : memref<5x16x32xf32, #tpu.memory_space<vmem>>, vector<1x16x32xf32>
    %34 = vector.shape_cast %33 : vector<1x16x32xf32> to vector<16x32xf32>
    %cst_11 = arith.constant dense<0.000000e+00> : vector<32x32xf32>
    %35 = tpu.matmul %32, %34, %cst_11 {dimension_numbers = #tpu.dot_dimension_numbers<[1], [0], [0], [1], [0, 0, 1, 1], [], []>} : vector<32x16xf32>, vector<16x32xf32>, vector<32x32xf32> -> vector<32x32xf32>
    %36 = arith.addf %18, %35 : vector<32x32xf32>
    %c1_i32_12 = arith.constant 1 : i32
    %37 = tpu.dynamic_rotate %0 by %c1_i32_12 dim 0 : vector<32x16xf32>, i32 -> vector<32x16xf32>
    %c-1_i32 = arith.constant -1 : i32
    %38 = vector.broadcast %c-1_i32 : i32 to vector<32x1xi32>
    %39 = arith.addi %17, %38 : vector<32x1xi32>
    %c0_i32_13 = arith.constant 0 : i32
    %40 = vector.broadcast %c0_i32_13 : i32 to vector<32x1xi32>
    %41 = arith.cmpi sge, %39, %40 : vector<32x1xi32>
    %c-1_i32_14 = arith.constant -1 : i32
    %42 = vector.broadcast %c-1_i32_14 : i32 to vector<32x1xi32>
    %43 = arith.addi %17, %42 : vector<32x1xi32>
    %c16_i32_15 = arith.constant 16 : i32
    %44 = vector.broadcast %c16_i32_15 : i32 to vector<32x1xi32>
    %45 = arith.cmpi slt, %43, %44 : vector<32x1xi32>
    %46 = arith.andi %41, %45 : vector<32x1xi1>
    %cst_16 = arith.constant 0.000000e+00 : f32
    %47 = vector.shape_cast %46 : vector<32x1xi1> to vector<32x1xi1>
    %48 = vector.broadcast %47 : vector<32x1xi1> to vector<32x16xi1>
    %49 = vector.broadcast %cst_16 : f32 to vector<32x16xf32>
    %50 = arith.select %48, %37, %49 : vector<32x16xi1>, vector<32x16xf32>
    %c1 = arith.constant 1 : index
    %c0_17 = arith.constant 0 : index
    %c0_18 = arith.constant 0 : index
    %51 = vector.load %arg2[%c1, %c0_17, %c0_18] : memref<5x16x32xf32, #tpu.memory_space<vmem>>, vector<1x16x32xf32>
    %52 = vector.shape_cast %51 : vector<1x16x32xf32> to vector<16x32xf32>
    %cst_19 = arith.constant dense<0.000000e+00> : vector<32x32xf32>
    %53 = tpu.matmul %50, %52, %cst_19 {dimension_numbers = #tpu.dot_dimension_numbers<[1], [0], [0], [1], [0, 0, 1, 1], [], []>} : vector<32x16xf32>, vector<16x32xf32>, vector<32x32xf32> -> vector<32x32xf32>
    %54 = arith.addf %36, %53 : vector<32x32xf32>
    %c2 = arith.constant 2 : index
    %c0_20 = arith.constant 0 : index
    %c0_21 = arith.constant 0 : index
    %55 = vector.load %arg2[%c2, %c0_20, %c0_21] : memref<5x16x32xf32, #tpu.memory_space<vmem>>, vector<1x16x32xf32>
    %56 = vector.shape_cast %55 : vector<1x16x32xf32> to vector<16x32xf32>
    %cst_22 = arith.constant dense<0.000000e+00> : vector<32x32xf32>
    %57 = tpu.matmul %0, %56, %cst_22 {dimension_numbers = #tpu.dot_dimension_numbers<[1], [0], [0], [1], [0, 0, 1, 1], [], []>} : vector<32x16xf32>, vector<16x32xf32>, vector<32x32xf32> -> vector<32x32xf32>
    %58 = arith.addf %54, %57 : vector<32x32xf32>
    %c31_i32 = arith.constant 31 : i32
    %59 = tpu.dynamic_rotate %0 by %c31_i32 dim 0 : vector<32x16xf32>, i32 -> vector<32x16xf32>
    %c1_i32_23 = arith.constant 1 : i32
    %60 = vector.broadcast %c1_i32_23 : i32 to vector<32x1xi32>
    %61 = arith.addi %17, %60 : vector<32x1xi32>
    %c0_i32_24 = arith.constant 0 : i32
    %62 = vector.broadcast %c0_i32_24 : i32 to vector<32x1xi32>
    %63 = arith.cmpi sge, %61, %62 : vector<32x1xi32>
    %c1_i32_25 = arith.constant 1 : i32
    %64 = vector.broadcast %c1_i32_25 : i32 to vector<32x1xi32>
    %65 = arith.addi %17, %64 : vector<32x1xi32>
    %c16_i32_26 = arith.constant 16 : i32
    %66 = vector.broadcast %c16_i32_26 : i32 to vector<32x1xi32>
    %67 = arith.cmpi slt, %65, %66 : vector<32x1xi32>
    %68 = arith.andi %63, %67 : vector<32x1xi1>
    %cst_27 = arith.constant 0.000000e+00 : f32
    %69 = vector.shape_cast %68 : vector<32x1xi1> to vector<32x1xi1>
    %70 = vector.broadcast %69 : vector<32x1xi1> to vector<32x16xi1>
    %71 = vector.broadcast %cst_27 : f32 to vector<32x16xf32>
    %72 = arith.select %70, %59, %71 : vector<32x16xi1>, vector<32x16xf32>
    %c3 = arith.constant 3 : index
    %c0_28 = arith.constant 0 : index
    %c0_29 = arith.constant 0 : index
    %73 = vector.load %arg2[%c3, %c0_28, %c0_29] : memref<5x16x32xf32, #tpu.memory_space<vmem>>, vector<1x16x32xf32>
    %74 = vector.shape_cast %73 : vector<1x16x32xf32> to vector<16x32xf32>
    %cst_30 = arith.constant dense<0.000000e+00> : vector<32x32xf32>
    %75 = tpu.matmul %72, %74, %cst_30 {dimension_numbers = #tpu.dot_dimension_numbers<[1], [0], [0], [1], [0, 0, 1, 1], [], []>} : vector<32x16xf32>, vector<16x32xf32>, vector<32x32xf32> -> vector<32x32xf32>
    %76 = arith.addf %58, %75 : vector<32x32xf32>
    %c30_i32 = arith.constant 30 : i32
    %77 = tpu.dynamic_rotate %0 by %c30_i32 dim 0 : vector<32x16xf32>, i32 -> vector<32x16xf32>
    %c2_i32_31 = arith.constant 2 : i32
    %78 = vector.broadcast %c2_i32_31 : i32 to vector<32x1xi32>
    %79 = arith.addi %17, %78 : vector<32x1xi32>
    %c0_i32_32 = arith.constant 0 : i32
    %80 = vector.broadcast %c0_i32_32 : i32 to vector<32x1xi32>
    %81 = arith.cmpi sge, %79, %80 : vector<32x1xi32>
    %c2_i32_33 = arith.constant 2 : i32
    %82 = vector.broadcast %c2_i32_33 : i32 to vector<32x1xi32>
    %83 = arith.addi %17, %82 : vector<32x1xi32>
    %c16_i32_34 = arith.constant 16 : i32
    %84 = vector.broadcast %c16_i32_34 : i32 to vector<32x1xi32>
    %85 = arith.cmpi slt, %83, %84 : vector<32x1xi32>
    %86 = arith.andi %81, %85 : vector<32x1xi1>
    %cst_35 = arith.constant 0.000000e+00 : f32
    %87 = vector.shape_cast %86 : vector<32x1xi1> to vector<32x1xi1>
    %88 = vector.broadcast %87 : vector<32x1xi1> to vector<32x16xi1>
    %89 = vector.broadcast %cst_35 : f32 to vector<32x16xf32>
    %90 = arith.select %88, %77, %89 : vector<32x16xi1>, vector<32x16xf32>
    %c4 = arith.constant 4 : index
    %c0_36 = arith.constant 0 : index
    %c0_37 = arith.constant 0 : index
    %91 = vector.load %arg2[%c4, %c0_36, %c0_37] : memref<5x16x32xf32, #tpu.memory_space<vmem>>, vector<1x16x32xf32>
    %92 = vector.shape_cast %91 : vector<1x16x32xf32> to vector<16x32xf32>
    %cst_38 = arith.constant dense<0.000000e+00> : vector<32x32xf32>
    %93 = tpu.matmul %90, %92, %cst_38 {dimension_numbers = #tpu.dot_dimension_numbers<[1], [0], [0], [1], [0, 0, 1, 1], [], []>} : vector<32x16xf32>, vector<16x32xf32>, vector<32x32xf32> -> vector<32x32xf32>
    %94 = arith.addf %76, %93 : vector<32x32xf32>
    %c0_39 = arith.constant 0 : index
    %c0_40 = arith.constant 0 : index
    %95 = vector.load %arg3[%c0_39, %c0_40] : memref<1x32xf32, #tpu.memory_space<vmem>>, vector<1x32xf32>
    %96 = vector.broadcast %95 : vector<1x32xf32> to vector<32x32xf32>
    %97 = arith.addf %94, %96 : vector<32x32xf32>
    %c0_41 = arith.constant 0 : index
    %c0_42 = arith.constant 0 : index
    %98 = vector.load %arg6[%c0_41, %c0_42] : memref<2x32xf32, #tpu.memory_space<vmem>>, vector<2x32xf32>
    %cst_43 = arith.constant dense<0.000000e+00> : vector<2x32xf32>
    %99 = tpu.matmul %98, %97, %cst_43 {dimension_numbers = #tpu.dot_dimension_numbers<[1], [0], [0], [1], [0, 0, 1, 1], [], []>} : vector<2x32xf32>, vector<32x32xf32>, vector<2x32xf32> -> vector<2x32xf32>
    %c0_44 = arith.constant 0 : index
    %c0_45 = arith.constant 0 : index
    %100 = vector.load %arg6[%c0_44, %c0_45] : memref<2x32xf32, #tpu.memory_space<vmem>>, vector<2x32xf32>
    %101 = arith.mulf %97, %97 : vector<32x32xf32>
    %cst_46 = arith.constant dense<0.000000e+00> : vector<2x32xf32>
    %102 = tpu.matmul %100, %101, %cst_46 {dimension_numbers = #tpu.dot_dimension_numbers<[1], [0], [0], [1], [0, 0, 1, 1], [], []>} : vector<2x32xf32>, vector<32x32xf32>, vector<2x32xf32> -> vector<2x32xf32>
    %c0_47 = arith.constant 0 : index
    %c0_48 = arith.constant 0 : index
    %103 = vector.load %arg8[%c0_47, %c0_48] : memref<32x8xf32, #tpu.memory_space<vmem>>, vector<32x8xf32>
    %cst_49 = arith.constant dense<0.000000e+00> : vector<2x8xf32>
    %104 = tpu.matmul %99, %103, %cst_49 {dimension_numbers = #tpu.dot_dimension_numbers<[1], [0], [0], [1], [0, 0, 1, 1], [], []>} : vector<2x32xf32>, vector<32x8xf32>, vector<2x8xf32> -> vector<2x8xf32>
    %c0_50 = arith.constant 0 : index
    %c0_51 = arith.constant 0 : index
    %105 = vector.load %arg8[%c0_50, %c0_51] : memref<32x8xf32, #tpu.memory_space<vmem>>, vector<32x8xf32>
    %cst_52 = arith.constant dense<0.000000e+00> : vector<2x8xf32>
    %106 = tpu.matmul %102, %105, %cst_52 {dimension_numbers = #tpu.dot_dimension_numbers<[1], [0], [0], [1], [0, 0, 1, 1], [], []>} : vector<2x32xf32>, vector<32x8xf32>, vector<2x8xf32> -> vector<2x8xf32>
    %107 = arith.mulf %104, %104 : vector<2x8xf32>
    %108 = arith.subf %106, %107 : vector<2x8xf32>
    %cst_53 = arith.constant 0.000000e+00 : f32
    %109 = vector.broadcast %cst_53 : f32 to vector<2x8xf32>
    %110 = arith.maximumf %108, %109 : vector<2x8xf32>
    %cst_54 = arith.constant 9.99999974E-6 : f32
    %111 = vector.broadcast %cst_54 : f32 to vector<2x8xf32>
    %112 = arith.addf %110, %111 : vector<2x8xf32>
    %113 = math.rsqrt %112 : vector<2x8xf32>
    %c0_55 = arith.constant 0 : index
    %c0_56 = arith.constant 0 : index
    %114 = vector.load %arg9[%c0_55, %c0_56] : memref<8x32xf32, #tpu.memory_space<vmem>>, vector<8x32xf32>
    %cst_57 = arith.constant dense<0.000000e+00> : vector<2x32xf32>
    %115 = tpu.matmul %104, %114, %cst_57 {dimension_numbers = #tpu.dot_dimension_numbers<[1], [0], [0], [1], [0, 0, 1, 1], [], []>} : vector<2x8xf32>, vector<8x32xf32>, vector<2x32xf32> -> vector<2x32xf32>
    %c0_58 = arith.constant 0 : index
    %c0_59 = arith.constant 0 : index
    %116 = vector.load %arg9[%c0_58, %c0_59] : memref<8x32xf32, #tpu.memory_space<vmem>>, vector<8x32xf32>
    %cst_60 = arith.constant dense<0.000000e+00> : vector<2x32xf32>
    %117 = tpu.matmul %113, %116, %cst_60 {dimension_numbers = #tpu.dot_dimension_numbers<[1], [0], [0], [1], [0, 0, 1, 1], [], []>} : vector<2x8xf32>, vector<8x32xf32>, vector<2x32xf32> -> vector<2x32xf32>
    %c0_61 = arith.constant 0 : index
    %c0_62 = arith.constant 0 : index
    %118 = vector.load %arg4[%c0_61, %c0_62] : memref<1x32xf32, #tpu.memory_space<vmem>>, vector<1x32xf32>
    %119 = vector.broadcast %118 : vector<1x32xf32> to vector<2x32xf32>
    %120 = arith.mulf %117, %119 : vector<2x32xf32>
    %c0_63 = arith.constant 0 : index
    %c0_64 = arith.constant 0 : index
    %121 = vector.load %arg5[%c0_63, %c0_64] : memref<1x32xf32, #tpu.memory_space<vmem>>, vector<1x32xf32>
    %122 = arith.mulf %115, %120 : vector<2x32xf32>
    %123 = vector.broadcast %121 : vector<1x32xf32> to vector<2x32xf32>
    %124 = arith.subf %123, %122 : vector<2x32xf32>
    %c0_65 = arith.constant 0 : index
    %c0_66 = arith.constant 0 : index
    %125 = vector.load %arg7[%c0_65, %c0_66] : memref<32x2xf32, #tpu.memory_space<vmem>>, vector<32x2xf32>
    %cst_67 = arith.constant dense<0.000000e+00> : vector<32x32xf32>
    %126 = tpu.matmul %125, %120, %cst_67 {dimension_numbers = #tpu.dot_dimension_numbers<[1], [0], [0], [1], [0, 0, 1, 1], [], []>} : vector<32x2xf32>, vector<2x32xf32>, vector<32x32xf32> -> vector<32x32xf32>
    %c0_68 = arith.constant 0 : index
    %c0_69 = arith.constant 0 : index
    %127 = vector.load %arg7[%c0_68, %c0_69] : memref<32x2xf32, #tpu.memory_space<vmem>>, vector<32x2xf32>
    %cst_70 = arith.constant dense<0.000000e+00> : vector<32x32xf32>
    %128 = tpu.matmul %127, %124, %cst_70 {dimension_numbers = #tpu.dot_dimension_numbers<[1], [0], [0], [1], [0, 0, 1, 1], [], []>} : vector<32x2xf32>, vector<2x32xf32>, vector<32x32xf32> -> vector<32x32xf32>
    %129 = arith.mulf %97, %126 : vector<32x32xf32>
    %130 = arith.addf %129, %128 : vector<32x32xf32>
    %cst_71 = arith.constant 0.000000e+00 : f32
    %131 = vector.broadcast %cst_71 : f32 to vector<32x32xf32>
    %132 = arith.maximumf %130, %131 : vector<32x32xf32>
    %133 = vector.broadcast %cst_71 : f32 to vector<32x32xf32>
    %134 = arith.subf %130, %133 : vector<32x32xf32>
    %135 = arith.cmpf one, %134, %134 : vector<32x32xf32>
    %136 = vector.broadcast %cst_71 : f32 to vector<32x32xf32>
    %137 = arith.addf %130, %136 : vector<32x32xf32>
    %138 = math.absf %134 : vector<32x32xf32>
    %cst_72 = arith.constant 0.000000e+00 : f32
    %139 = vector.broadcast %cst_72 : f32 to vector<32x32xf32>
    %140 = arith.subf %139, %138 : vector<32x32xf32>
    %141 = math.exp %140 : vector<32x32xf32>
    %142 = math.log1p %141 : vector<32x32xf32>
    %143 = arith.addf %132, %142 : vector<32x32xf32>
    %144 = arith.select %135, %137, %143 : vector<32x32xi1>, vector<32x32xf32>
    %145 = math.tanh %144 : vector<32x32xf32>
    %146 = arith.mulf %130, %145 : vector<32x32xf32>
    %c0_73 = arith.constant 0 : index
    %c0_74 = arith.constant 0 : index
    %147 = vector.load %arg10[%c0_73, %c0_74] : memref<32x32xf32, #tpu.memory_space<vmem>>, vector<32x32xf32>
    tpu.vector_store %arg10[%c0_73, %c0_74], %146 {strides = array<i32>} : memref<32x32xf32, #tpu.memory_space<vmem>>, vector<32x32xf32>,
    return
  }
  func.func @transform_0(%arg0: i32) -> (i32, i32) {
    %c0_i32 = arith.constant 0 : i32
    %c0_i32_0 = arith.constant 0 : i32
    return %arg0, %c0_i32 : i32, i32
  }
  func.func @transform_1(%arg0: i32) -> (i32, i32, i32) {
    %c0_i32 = arith.constant 0 : i32
    %c0_i32_0 = arith.constant 0 : i32
    %c0_i32_1 = arith.constant 0 : i32
    %c0_i32_2 = arith.constant 0 : i32
    return %c0_i32, %c0_i32_0, %c0_i32_1 : i32, i32, i32
  }
  func.func @transform_2(%arg0: i32) -> (i32, i32) {
    %c0_i32 = arith.constant 0 : i32
    %c0_i32_0 = arith.constant 0 : i32
    %c0_i32_1 = arith.constant 0 : i32
    return %c0_i32, %c0_i32_0 : i32, i32
  }
  func.func @transform_3(%arg0: i32) -> (i32, i32) {
    %c0_i32 = arith.constant 0 : i32
    %c0_i32_0 = arith.constant 0 : i32
    %c0_i32_1 = arith.constant 0 : i32
    return %c0_i32, %c0_i32_0 : i32, i32
  }
  func.func @transform_4(%arg0: i32) -> (i32, i32) {
    %c0_i32 = arith.constant 0 : i32
    %c0_i32_0 = arith.constant 0 : i32
    %c0_i32_1 = arith.constant 0 : i32
    return %c0_i32, %c0_i32_0 : i32, i32
  }
  func.func @transform_5(%arg0: i32) -> (i32, i32) {
    %c0_i32 = arith.constant 0 : i32
    %c0_i32_0 = arith.constant 0 : i32
    %c0_i32_1 = arith.constant 0 : i32
    return %c0_i32, %c0_i32_0 : i32, i32
  }
  func.func @transform_6(%arg0: i32) -> (i32, i32) {
    %c0_i32 = arith.constant 0 : i32
    %c0_i32_0 = arith.constant 0 : i32
    %c0_i32_1 = arith.constant 0 : i32
    return %c0_i32, %c0_i32_0 : i32, i32
  }
  func.func @transform_7(%arg0: i32) -> (i32, i32) {
    %c0_i32 = arith.constant 0 : i32
    %c0_i32_0 = arith.constant 0 : i32
    %c0_i32_1 = arith.constant 0 : i32
    return %c0_i32, %c0_i32_0 : i32, i32
  }
  func.func @transform_8(%arg0: i32) -> (i32, i32) {
    %c0_i32 = arith.constant 0 : i32
    %c0_i32_0 = arith.constant 0 : i32
    %c0_i32_1 = arith.constant 0 : i32
    return %c0_i32, %c0_i32_0 : i32, i32
  }
  func.func @transform_9(%arg0: i32) -> (i32, i32) {
    %c0_i32 = arith.constant 0 : i32
    %c0_i32_0 = arith.constant 0 : i32
    return %arg0, %c0_i32 : i32, i32
  }
}

</mosaic_0001>

<bundles_post_ra>
// kernel: tpu_custom_call.1
= control target key start
LH: loop header
LB: loop body
LE: loop exit
PB: predicated region body
PF: predicated region fallthrough
CT: control target
= control target key end

     0   :  { %v37_v3 = vlaneseq  ;;  %s2207_s0 = inlined_call_operand.vmem [shape: f32[32,16], index: 0, kind: input, shape index: {}]   ;;  %s2208_s1 = inlined_call_operand.vmem [shape: f32[5,16,32], index: 1, kind: input, shape index: {}]   ;;  %s2209_s2 = inlined_call_operand.vmem [shape: f32[1,32], index: 2, kind: input, shape index: {}]   ;;  %s2210_s3 = inlined_call_operand.vmem [shape: f32[1,32], index: 3, kind: input, shape index: {}]   ;;  %s2211_s4 = inlined_call_operand.vmem [shape: f32[1,32], index: 4, kind: input, shape index: {}]   ;;  %s2212_s5 = inlined_call_operand.vmem [shape: f32[2,32], index: 5, kind: input, shape index: {}]   ;;  %s2213_s6 = inlined_call_operand.vmem [shape: f32[32,2], index: 6, kind: input, shape index: {}]   ;;  %s2214_s7 = inlined_call_operand.vmem [shape: f32[32,8], index: 7, kind: input, shape index: {}]   ;;  %s2215_s8 = inlined_call_operand.vmem [shape: f32[8,32], index: 8, kind: input, shape index: {}]   ;;  %s2216_s9 = inlined_call_operand.hbm [shape: f32[32,32], index: 9, kind: output, shape index: {}]  }
   0x1   :  { %v1532_v0 = vld [vmem:[%s2208_s1 + $0x10] sm:$0xff]  ;;  %v1533_v1 = vld [vmem:[%s2208_s1 + $0x18] sm:$0xff]  ;;  %v1944_v2 = vld [vmem:[%s2207_s0] sm:$0xff] }
   0x2   :  { %v1763_v4 = vpack.c.bf16 %v1533_v1, %v1532_v0  ;;  %v1949_v5 = vld [vmem:[%s2207_s0 + $0x18] sm:$0xff]  ;;  %v1954_v6 = vld [vmem:[%s2207_s0 + $0x8] sm:$0xff]  ;;  %v1959_v7 = vld [vmem:[%s2207_s0 + $0x10] sm:$0xff]  ;;  %v1961_v8 = vshrl.u32 %v37_v3, 7  ;;  %v129_v9 = vrot.slane %v1944_v2, 7  ;;  %v90_v18 = vrot.slane %v1944_v2, 6 }
   0x3   :  { %v132_v10 = vrot.slane %v1949_v5, 7  ;;  %v127_v11 = vld [vmem:[%s2208_s1] sm:$0xff]  ;;  %v128_v12 = vld [vmem:[%s2208_s1 + $0x8] sm:$0xff]  ;;  %v130_v13 = vrot.slane %v1954_v6, 7  ;;  %v131_v17 = vrot.slane %v1959_v7, 7  ;;  %v93_v19 = vrot.slane %v1949_v5, 6 }
   0x4   :  { %1764 = vmatprep.subr.bf16.mxu0 %v1763_v4  ;;  %v1767_v14 = vpack.c.bf16 %v128_v12, %v127_v11  ;;  %v46_v15 = vand.u32 15, %v1961_v8  ;;  %vm133_vm0 = vcmp.lt.s32.totalorder %v1961_v8, 1  ;;  %v40_v16 = vadd.s32 16, %v1961_v8 }
   0x5   :  { %1766 = vmatpush3.bf16.msra.mxu0 %v1763_v4 }
   0x6   :  { %1768 = vmatprep.subr.bf16.mxu0 %v1767_v14 }
   0x7   :  { %14 = vsyncpa [#allocation3], 0  ;;  %v137_v20 = vsel %vm133_vm0, %v132_v10, %v129_v9  ;;  %v138_v21 = vadd.s32 4294967295, %v46_v15  ;;  %v60_v22 = vand.u32 15, %v40_v16  ;;  %v99_v23 = vadd.s32 4294967294, %v46_v15  ;;  %v1542_v24 = vld [vmem:[%s2208_s1 + $0x20] sm:$0xff] }
   0x8   :  { %v1543_v25 = vld [vmem:[%s2208_s1 + $0x28] sm:$0xff]  ;;  %vm169_vm1 = vcmask 130048   ;;  %vm94_vm2 = vcmp.lt.s32.totalorder %v1961_v8, 2  ;;  %v136_v26 = vsel %vm133_vm0, %v129_v9, %v130_v13  ;;  %v135_v27 = vsel %vm133_vm0, %v130_v13, %v131_v17  ;;  %v1548_v39 = vld [vmem:[%s2208_s1 + $0x30] sm:$0xff]  ;;  %v1549_v40 = vld [vmem:[%s2208_s1 + $0x38] sm:$0xff] }
   0x9   :  { %vm142_vm3 = vcmp.ge.s32.totalorder %v138_v21, 0  ;;  %v140_v28 = vadd.s32 4294967295, %v60_v22  ;;  %v92_v30 = vrot.slane %v1959_v7, 6  ;;  %v1771_v31 = vpack.c.bf16 %v1543_v25, %v1542_v24  ;;  %v1554_v48 = vld [vmem:[%s2208_s1 + $0x40] sm:$0xff]  ;;  %v1555_v49 = vld [vmem:[%s2208_s1 + $0x48] sm:$0xff] }
   0xa   :  { %v162_v29 = vsel %vm142_vm3, %v137_v20, 0.0  ;;  %v98_v32 = vsel %vm94_vm2, %v93_v19, %v90_v18  ;;  %vm103_vm5 = vcmp.ge.s32.totalorder %v99_v23, 0  ;;  %v101_v33 = vadd.s32 4294967294, %v60_v22 }
   0xb   :  { %1647 = vmatprep.mubr.msk.f32.mxu0 %vm169_vm1, %v162_v29  ;;  %vm144_vm4 = vcmp.ge.s32.totalorder %v140_v28, 0  ;;  %v134_v35 = vsel %vm133_vm0, %v131_v17, %v132_v10  ;;  %v91_v36 = vrot.slane %v1954_v6, 6  ;;  %v123_v37 = vsel %vm103_vm5, %v98_v32, 0.0  ;;  %v911_v32 = vld [vmem:[%s2214_s7 + $0x8] sm:$0xff] }
   0xc   :  { %1648 = vmatmul.mubr.msk.f32.vlgmr.msra.gmra.mrb[0].mxu0 %vm169_vm1, %v136_v26  ;;  %v164_v34 = vsel %vm144_vm4, %v135_v27, 0.0  ;;  %vm105_vm6 = vcmp.ge.s32.totalorder %v101_v33, 0  ;;  %v1775_v43 = vpack.c.bf16 %v1549_v40, %v1548_v39  ;;  %v39_v44 = vadd.s32 8, %v1961_v8  ;;  %v761_v27 = vld [vmem:[%s2212_s5] sm:$0x3] }
   0xd   :  { %1650 = vmatprep.mubr.msk.f32.mxu0 %vm169_vm1, %v164_v34  ;;  %1770 = vmatpush3.bf16.msra.mxu0 %v1767_v14  ;;  %v96_v38 = vsel %vm94_vm2, %v91_v36, %v92_v30  ;;  %v97_v41 = vsel %vm94_vm2, %v90_v18, %v91_v36  ;;  %v95_v45 = vsel %vm94_vm2, %v92_v30, %v93_v19  ;;  %v41_v47 = vadd.s32 24, %v1961_v8  ;;  %v913_v36 = vld [vmem:[%s2214_s7 + $0x18] sm:$0xff] }
   0xe   :  { %1772 = vmatprep.subr.bf16.mxu0 %v1771_v31  ;;  %v125_v42 = vsel %vm105_vm6, %v96_v38, 0.0  ;;  %v53_v46 = vand.u32 15, %v39_v44  ;;  %v468_v50 = vrot.slane %v1944_v2, 1  ;;  %v469_v51 = vrot.slane %v1954_v6, 1 }
   0xf   :  { %v470_v52 = vrot.slane %v1959_v7, 1  ;;  %v67_v54 = vand.u32 15, %v41_v47  ;;  %v1779_v55 = vpack.c.bf16 %v1555_v49, %v1554_v48  ;;  %vm472_vm7 = vcmp.lt.s32.totalorder %v1961_v8, 7 }
  0x10   :  { %1651 = vmatmul.mubr.msk.f32.gmra.mrb[2].mxu0 %vm169_vm1, %v134_v35  ;;  %v478_v53 = vadd.s32 1, %v53_v46  ;;  %v471_v56 = vrot.slane %v1949_v5, 1  ;;  %v475_v57 = vsel %vm472_vm7, %v468_v50, %v469_v51  ;;  %v609_v60 = vrot.slane %v1944_v2, 2  ;;  %v912_v35 = vld [vmem:[%s2214_s7 + $0x10] sm:$0xff] }
  0x11   :  { %1657 = vmatprep.mubr.msk.f32.mxu0 %vm169_vm1, %v123_v37  ;;  %v474_v58 = vsel %vm472_vm7, %v469_v51, %v470_v52  ;;  %v480_v59 = vadd.s32 1, %v67_v54  ;;  %v610_v63 = vrot.slane %v1954_v6, 2  ;;  %vm613_vm9 = vcmp.lt.s32.totalorder %v1961_v8, 6  ;;  %v1560_v8 = vld [vmem:[%s2209_s2] ss:$0 sm:$0xff] }
  0x12   :  { %vm486_vm8 = vcmp.lt.s32.totalorder %v478_v53, 16  ;;  %v473_v62 = vsel %vm472_vm7, %v470_v52, %v471_v56  ;;  %v476_v0 = vsel %vm472_vm7, %v471_v56, %v468_v50  ;;  %v611_v1 = vrot.slane %v1959_v7, 2  ;;  %v1230_v52 = vld [vmem:[%s2213_s6] sm:$0xff] }
  0x13   :  { %v502_v61 = vsel %vm486_vm8, %v474_v58, 0.0  ;;  %vm488_vm10 = vcmp.lt.s32.totalorder %v480_v59, 16  ;;  %v619_v3 = vadd.s32 2, %v53_v46  ;;  %v616_v4 = vsel %vm613_vm9, %v609_v60, %v610_v63  ;;  %v1568_v59 = vld [vmem:[%s2211_s4] ss:$0 sm:$0xff]  ;;  %s1882_s4 = smov [#allocation2]  }
  0x14   :  { %1658 = vmatmul.mubr.msk.f32.vlgmr.msra.gmra.mrb[0].mxu0 %vm169_vm1, %v97_v41  ;;  %v612_v9 = vrot.slane %v1949_v5, 2  ;;  %v621_v10 = vadd.s32 2, %v67_v54  ;;  %vm1880_vm13 = vmmov 0   ;;  %v1881_v14 = vmov 0.0  }
  0x15   :  { %1660 = vmatprep.mubr.msk.f32.mxu0 %vm169_vm1, %v125_v42  ;;  %1774 = vmatpush3.bf16.msra.mxu0 %v1771_v31  ;;  %vm627_vm11 = vcmp.lt.s32.totalorder %v619_v3, 16  ;;  %vm762_vm14 = vcmask 261120   ;;  %v910_v31 = vld [vmem:[%s2214_s7] sm:$0xff]  ;;  %v1799_v37 = vpack.c.bf16 %v913_v36, %v912_v35  ;;  %vm1066_vm15 = vcmask 64512  }
  0x16   :  { %1776 = vmatprep.subr.bf16.mxu0 %v1775_v43  ;;  %v614_v11 = vsel %vm613_vm9, %v611_v1, %v612_v9  ;;  %v617_v12 = vsel %vm613_vm9, %v612_v9, %v609_v60  ;;  %vm629_vm12 = vcmp.lt.s32.totalorder %v621_v10, 16  ;;  %1701 = vmatprep.mubr.msk.f32.mxu1 %vm1880_vm13, %v1881_v14  ;;  %v1796_v34 = vpack.c.bf16 %v911_v32, %v910_v31  ;;  %v1065_v42 = vld [vmem:[%s2215_s8] sm:$0xff]  ;;  %v1231_v60 = vld [vmem:[%s2213_s6 + $0x8] sm:$0xff] }
  0x17   :  { %v645_v13 = vsel %vm629_vm12, %v617_v12, 0.0  ;;  %vm1234_vm0 = vcmask 15360  }
  0x18   :  { %1661 = vmatmul.mubr.msk.f32.gmra.mrb[2].mxu0 %vm169_vm1, %v95_v45 }
  0x19   :  { %1667 = vmatprep.mubr.msk.f32.mxu0 %vm169_vm1, %v1944_v2  ;;  %v504_v2 = vsel %vm488_vm10, %v476_v0, 0.0  ;;  %v1233_v0 = vld [vmem:[%s2213_s6 + $0x18] sm:$0xff] }
  0x1c   :  { %1668 = vmatmul.mubr.msk.f32.vlgmr.msra.gmra.mrb[0].mxu0 %vm169_vm1, %v1954_v6  ;;  %v615_v6 = vsel %vm613_vm9, %v610_v63, %v611_v1 }
  0x1d   :  { %1670 = vmatprep.mubr.msk.f32.mxu0 %vm169_vm1, %v1959_v7  ;;  %1778 = vmatpush3.bf16.msra.mxu0 %v1775_v43  ;;  %v643_v7 = vsel %vm627_vm11, %v615_v6, 0.0 }
  0x1e   :  { %1780 = vmatprep.subr.bf16.mxu0 %v1779_v55 }
  0x20   :  { %1671 = vmatmul.mubr.msk.f32.gmra.mrb[2].mxu0 %vm169_vm1, %v1949_v5  ;;  %v1879_v5 = vmov 0.0|0.0  }
  0x21   :  { %1677 = vmatprep.mubr.msk.f32.mxu0 %vm169_vm1, %v475_v57  ;;  %1783 = vmatprep.subr.bf16.mxu1 %v1879_v5 }
  0x24   :  { %1678 = vmatmul.mubr.msk.f32.vlgmr.msra.gmra.mrb[0].mxu0 %vm169_vm1, %v502_v61 }
  0x25   :  { %1680 = vmatprep.mubr.msk.f32.mxu0 %vm169_vm1, %v473_v62  ;;  %1782 = vmatpush3.bf16.msra.mxu0 %v1779_v55  ;;  %v1567_v55 = vld [vmem:[%s2210_s3] ss:$0 sm:$0xff]  ;;  %v1232_v62 = vld [vmem:[%s2213_s6 + $0x10] sm:$0xff]  ;;  %s1521_s6 = sshll.u32 %s1882_s4, 4  ;;  %s1522_s6 = int_to_ptr.vmem [resolvable:$true] %s1521_s6 }
  0x26   :  { %s1855_s13 = scalar_lea.vmem %s1522_s6, 512  ;;  %p1860_p1 = scmp.lt.s32.totalorder %s1522_s6, %s1522_s6 }
  0x27   :  { %p1856_p0 = scmp.ne.s32.totalorder %s1522_s6, %s1855_s13  ;;  %p1861_p2 = scmp.lt.s32.totalorder %s1855_s13, %s1855_s13 }
  0x28   :  { %1681 = vmatmul.mubr.msk.f32.gmra.mrb[2].mxu0 %vm169_vm1, %v504_v2 }
  0x29   :  { %1687 = vmatprep.mubr.msk.f32.mxu0 %vm169_vm1, %v616_v4  ;;  %p1862_p3 = por %p1861_p2, %p1860_p1 }
  0x2b   :  { %p1863_p4 = pnand %p1862_p3, %p1856_p0 }
  0x2c   :  { %1688 = vmatmul.mubr.msk.f32.vlgmr.msra.gmra.mrb[0].mxu0 %vm169_vm1, %v643_v7 }
  0x2d   :  { %1690 = vmatprep.mubr.msk.f32.mxu0 %vm169_vm1, %v614_v11 }
  0x30   :  { %1691 = vmatmul.mubr.msk.f32.gmra.mrb[2].mxu0 %vm169_vm1, %v645_v13  ;;  %vm1247_vm1 = vcmask 1041408  }
  0x31   :  { %1749 = vmatprep.mubr.msk.f32.mxu0 %vm1234_vm0, %v1230_v52 }
  0xff   :  { %v1689_v15 = vpop.f32.mrb[0].mxu0 }
 0x100   :  { %v2072_v16 = vadd.f32 %v1689_v15, %v1560_v8  ;;  %v727_v17 = vpop.f32.mrb[1].mxu0 }
 0x101   :  { %v2074_v18 = vadd.f32 %v1560_v8, %v727_v17 }
 0x102   :  { %v837_v24 = vmul.f32 %v2072_v16, %v2072_v16 }
 0x103   :  { %v1692_v19 = vpop.f32.mrb[2].mxu0  ;;  %v1784_v20 = vpack.c.bf16 %v2072_v16, %v2074_v18  ;;  %v836_v25 = vmul.f32 %v2074_v18, %v2074_v18 }
 0x104   :  { %v2078_v21 = vadd.f32 %v1692_v19, %v1560_v8  ;;  %v737_v22 = vpop.f32.mrb[3].mxu0 }
 0x105   :  { %v2080_v23 = vadd.f32 %v1560_v8, %v737_v22  ;;  %1785 = vmatpush3.bf16.msra.mxu1 %v1784_v20  ;;  %v1790_v28 = vpack.c.bf16 %v837_v24, %v836_v25 }
 0x106   :  { %1786 = vmatprep.subr.bf16.mxu1 %v1879_v5  ;;  %v839_v29 = vmul.f32 %v2078_v21, %v2078_v21 }
 0x107   :  { %v1787_v26 = vpack.c.bf16 %v2078_v21, %v2080_v23  ;;  %v838_v30 = vmul.f32 %v2080_v23, %v2080_v23 }
 0x109   :  { %1788 = vmatpush3.bf16.msra.mxu1 %v1787_v26  ;;  %v1793_v33 = vpack.c.bf16 %v839_v29, %v838_v30 }
 0x10a   :  { %1789 = vmatprep.subr.bf16.mxu1 %v1879_v5 }
 0x10c   :  { %1702 = vmatmul.mubr.msk.f32.vlgmr.msra.gmra.mrb[0].mxu1 %vm762_vm14, %v761_v27 }
 0x10d   :  { %1791 = vmatpush3.bf16.msra.mxu1 %v1790_v28  ;;  %1712 = vmatprep.mubr.msk.f32.mxu1 %vm1880_vm13, %v1881_v14 }
 0x10e   :  { %1792 = vmatprep.subr.bf16.mxu1 %v1879_v5 }
 0x111   :  { %1794 = vmatpush3.bf16.msra.mxu1 %v1793_v33 }
 0x112   :  { %1795 = vmatprep.subr.bf16.mxu1 %v1879_v5 }
 0x114   :  { %1713 = vmatmul.mubr.msk.f32.vlgmr.msra.gmra.mrb[2].mxu1 %vm762_vm14, %v761_v27 }
 0x115   :  { %1797 = vmatpush3.bf16.msra.mxu1 %v1796_v34  ;;  %1723 = vmatprep.mubr.msk.f32.mxu1 %vm1880_vm13, %v1881_v14 }
 0x116   :  { %1798 = vmatprep.subr.bf16.mxu1 %v1879_v5 }
 0x119   :  { %1800 = vmatpush3.bf16.msra.mxu1 %v1799_v37 }
 0x11a   :  { %1801 = vmatprep.subr.bf16.mxu1 %v1879_v5 }
 0x1df   :  { %v832_v38 = vpop.f32.mrb[0].mxu1 }
 0x1e0   :  { %v1703_v39 = vpop.f32.mrb[1].mxu1  ;;  %1724 = vmatmul.mubr.msk.f32.vlgmr.msra.gmra.mrb[4].mxu1 %vm762_vm14, %v832_v38 }
 0x1e1   :  { %1803 = vmatpush3.bf16.msra.mxu1 %v1796_v34  ;;  %1734 = vmatprep.mubr.msk.f32.mxu1 %vm1880_vm13, %v1881_v14 }
 0x1e2   :  { %1804 = vmatprep.subr.bf16.mxu1 %v1879_v5 }
 0x1e5   :  { %1806 = vmatpush3.bf16.msra.mxu1 %v1799_v37 }
 0x1e6   :  { %1737 = vmatprep.subr.mxu1 %v1881_v14 }
 0x1e7   :  { %v906_v40 = vpop.f32.mrb[2].mxu1 }
 0x1e8   :  { %v1714_v41 = vpop.f32.mrb[3].mxu1  ;;  %1735 = vmatmul.mubr.msk.f32.vlgmr.msra.gmra.mrb[6].mxu1 %vm762_vm14, %v906_v40 }
 0x1e9   :  { %1739 = vmatprep.mubr.msk.f32.mxu1 %vm1880_vm13, %v1881_v14  ;;  %1738 = vmatpush3.msra.mxu1 %v1065_v42 }
 0x1ea   :  { %1742 = vmatprep.subr.mxu1 %v1881_v14 }
 0x2b3   :  { %v983_v43 = vpop.f32.mrb[4].mxu1 }
 0x2b4   :  { %v1725_v44 = vpop.f32.mrb[5].mxu1  ;;  %1740 = vmatmul.mubr.msk.f32.vlgmr.msra.gmra.mrb[8].mxu1 %vm1066_vm15, %v983_v43  ;;  %v1060_v45 = vmul.f32 %v983_v43, %v983_v43 }
 0x2b5   :  { %1743 = vmatpush3.msra.mxu1 %v1065_v42  ;;  %1744 = vmatprep.mubr.msk.f32.mxu1 %vm1880_vm13, %v1881_v14 }
 0x2bb   :  { %v1056_v46 = vpop.f32.mrb[6].mxu1 }
 0x2bc   :  { %v1061_v47 = vsub.f32 %v1056_v46, %v1060_v45  ;;  %v1736_v48 = vpop.f32.mrb[7].mxu1 }
 0x2be   :  { %v1062_v49 = vmax.f32 %v1061_v47, 0.0 }
 0x2c0   :  { %v1063_v50 = vadd.f32 1e-05, %v1062_v49 }
 0x2c2   :  { %1829 = vrsqrt.f32 %v1063_v50 }
 0x2cc   :  { %v1830_v51 = vpop.eup %1829 }
 0x2cd   :  { %1745 = vmatmul.mubr.msk.f32.vlgmr.msra.gmra.mrb[10].mxu1 %vm1066_vm15, %v1830_v51 }
 0x2ce   :  { %1757 = vmatprep.mubr.msk.f32.mxu1 %vm1234_vm0, %v1230_v52 }
 0x387   :  { %v1136_v53 = vpop.f32.mrb[8].mxu1 }
 0x388   :  { %v1741_v54 = vpop.f32.mrb[9].mxu1 }
 0x3a0   :  { %v1209_v56 = vpop.f32.mrb[10].mxu1 }
 0x3a1   :  { %v1220_v57 = vmul.f32 %v1567_v55, %v1209_v56  ;;  %v1746_v58 = vpop.f32.mrb[11].mxu1 }
 0x3a3   :  { %v1222_v61 = vmul.f32 %v1220_v57, %v1136_v53  ;;  %1747 = vmatprep.subr.msk.mxu0 %vm1247_vm1, %v1220_v57 }
 0x3a4   :  { %1748 = vmatpush3.msk.msra.mxu0 %vm1247_vm1, %v1220_v57 }
 0x3a5   :  { %v1229_v63 = vsub.f32 %v1568_v59, %v1222_v61  ;;  %1750 = vmatmul.mubr.msk.f32.vlgmr.msra.gmra.mrb[4].mxu0 %vm1234_vm0, %v1231_v60 }
 0x3a6   :  { %1752 = vmatprep.mubr.msk.f32.mxu0 %vm1234_vm0, %v1232_v62 }
 0x3a7   :  { %1755 = vmatprep.subr.msk.mxu1 %vm1247_vm1, %v1229_v63 }
 0x3a8   :  { %1756 = vmatpush3.msk.msra.mxu1 %vm1247_vm1, %v1229_v63 }
 0x3a9   :  { %1753 = vmatmul.mubr.msk.f32.gmra.mrb[6].mxu0 %vm1234_vm0, %v1233_v0  ;;  %1758 = vmatmul.mubr.msk.f32.vlgmr.msra.gmra.mrb[12].mxu1 %vm1234_vm0, %v1231_v60 }
 0x3aa   :  { %1760 = vmatprep.mubr.msk.f32.mxu1 %vm1234_vm0, %v1232_v62 }
 0x3ad   :  { %1761 = vmatmul.mubr.msk.f32.gmra.mrb[14].mxu1 %vm1234_vm0, %v1233_v0 }
 0x478   :  { %v1751_v1 = vpop.f32.mrb[4].mxu0 }
 0x479   :  { %v1317_v3 = vpop.f32.mrb[5].mxu0  ;;  %v1425_v2 = vmul.f32 %v1751_v1, %v2072_v16 }
 0x47a   :  { %v1424_v4 = vmul.f32 %v1317_v3, %v2074_v18 }
 0x47c   :  { %v1754_v6 = vpop.f32.mrb[6].mxu0  ;;  %v1759_v9 = vpop.f32.mrb[12].mxu1 }
 0x47d   :  { %v2154_v10 = vadd.f32 %v1759_v9, %v1425_v2  ;;  %v1327_v7 = vpop.f32.mrb[7].mxu0  ;;  %v1405_v11 = vpop.f32.mrb[13].mxu1  ;;  %v1427_v13 = vmul.f32 %v1754_v6, %v2078_v21 }
 0x47e   :  { %v2156_v12 = vadd.f32 %v1424_v4, %v1405_v11  ;;  %v1426_v14 = vmul.f32 %v1327_v7, %v2080_v23 }
 0x47f   :  { %v1445_v5 = vand.u32 2147483647, %v2154_v10  ;;  %v1433_v46 = vmax.f32 %v2154_v10, 0.0  ;;  %vm1437_vm2 = vcmp.ne.f32.partialorder %v2154_v10, %v2154_v10 }
 0x480   :  { %v1444_v8 = vand.u32 2147483647, %v2156_v12  ;;  %v1762_v15 = vpop.f32.mrb[14].mxu1  ;;  %v1432_v56 = vmax.f32 %v2156_v12, 0.0  ;;  %vm1436_vm5 = vcmp.ne.f32.partialorder %v2156_v12, %v2156_v12 }
 0x481   :  { %v1449_v16 = vsub.f32 0.0, %v1445_v5  ;;  %v2162_v17 = vadd.f32 %v1762_v15, %v1427_v13  ;;  %v1415_v18 = vpop.f32.mrb[15].mxu1 }
 0x482   :  { %v1448_v19 = vsub.f32 0.0, %v1444_v8  ;;  %v2164_v20 = vadd.f32 %v1426_v14, %v1415_v18 }
 0x483   :  { %v1454_v22 = vmul.f32 1.442695, %v1449_v16  ;;  %v1447_v24 = vand.u32 2147483647, %v2162_v17  ;;  %v1435_v61 = vmax.f32 %v2162_v17, 0.0  ;;  %vm1439_vm8 = vcmp.ne.f32.partialorder %v2162_v17, %v2162_v17 }
 0x484   :  { %v1452_v25 = vmul.f32 1.442695, %v1448_v19  ;;  %v1446_v21 = vand.u32 2147483647, %v2164_v20  ;;  %v1434_v3 = vmax.f32 %v2164_v20, 0.0  ;;  %vm1438_vm9 = vcmp.ne.f32.partialorder %v2164_v20, %v2164_v20 }
 0x485   :  { %1831 = vpow2.f32 %v1454_v22  ;;  %v1451_v26 = vsub.f32 0.0, %v1447_v24 }
 0x486   :  { %1833 = vpow2.f32 %v1452_v25  ;;  %v1450_v23 = vsub.f32 0.0, %v1446_v21 }
 0x487   :  { %v1458_v27 = vmul.f32 1.442695, %v1451_v26 }
 0x488   :  { %v1456_v28 = vmul.f32 1.442695, %v1450_v23 }
 0x489   :  { %1835 = vpow2.f32 %v1458_v27 }
 0x48a   :  { %1837 = vpow2.f32 %v1456_v28 }
 0x48f   :  { %v1832_v29 = vpop.eup %1831 }
 0x490   :  { %v1834_v30 = vpop.eup %1833  ;;  %v1469_v31 = vadd.f32 1.0, %v1832_v29  ;;  %v1472_v36 = vmul.f32 -0.5, %v1832_v29  ;;  %v1475_v40 = vand.u32 2147483647, %v1832_v29 }
 0x491   :  { %v1460_v32 = vadd.f32 1.0, %v1834_v30  ;;  %v1463_v38 = vmul.f32 -0.5, %v1834_v30  ;;  %v1466_v44 = vand.u32 2147483647, %v1834_v30 }
 0x492   :  { %1839 = vlog2.f32 %v1469_v31  ;;  %v1473_v39 = vadd.f32 1.0, %v1472_v36  ;;  %vm1476_vm3 = vcmp.lt.f32.partialorder %v1475_v40, 0.0004427343 }
 0x493   :  { %v1836_v33 = vpop.eup %1835  ;;  %1841 = vlog2.f32 %v1460_v32  ;;  %v1464_v42 = vadd.f32 1.0, %v1463_v38  ;;  %vm1467_vm4 = vcmp.lt.f32.partialorder %v1466_v44, 0.0004427343 }
 0x494   :  { %v1838_v34 = vpop.eup %1837  ;;  %v1487_v35 = vadd.f32 1.0, %v1836_v33  ;;  %v1490_v41 = vmul.f32 -0.5, %v1836_v33  ;;  %v1474_v49 = vmul.f32 %v1832_v29, %v1473_v39  ;;  %v1493_v53 = vand.u32 2147483647, %v1836_v33 }
 0x495   :  { %v1478_v37 = vadd.f32 1.0, %v1838_v34  ;;  %v1481_v43 = vmul.f32 -0.5, %v1838_v34  ;;  %v1465_v52 = vmul.f32 %v1834_v30, %v1464_v42  ;;  %v1484_v57 = vand.u32 2147483647, %v1838_v34 }
 0x496   :  { %1843 = vlog2.f32 %v1487_v35  ;;  %v1491_v50 = vadd.f32 1.0, %v1490_v41  ;;  %vm1494_vm6 = vcmp.lt.f32.partialorder %v1493_v53, 0.0004427343 }
 0x497   :  { %1845 = vlog2.f32 %v1478_v37  ;;  %v1482_v54 = vadd.f32 1.0, %v1481_v43  ;;  %vm1485_vm7 = vcmp.lt.f32.partialorder %v1484_v57, 0.0004427343 }
 0x498   :  { %v1492_v1 = vmul.f32 %v1836_v33, %v1491_v50 }
 0x499   :  { %v1483_v6 = vmul.f32 %v1838_v34, %v1482_v54 }
 0x49c   :  { %v1840_v45 = vpop.eup %1839 }
 0x49d   :  { %v1842_v47 = vpop.eup %1841  ;;  %v1471_v48 = vmul.f32 0.6931472, %v1840_v45 }
 0x49e   :  { %v1462_v51 = vmul.f32 0.6931472, %v1842_v47 }
 0x49f   :  { %v1477_v55 = vsel %vm1476_vm3, %v1474_v49, %v1471_v48 }
 0x4a0   :  { %v1844_v58 = vpop.eup %1843  ;;  %v1497_v59 = vadd.f32 %v1477_v55, %v1433_v46  ;;  %v1468_v60 = vsel %vm1467_vm4, %v1465_v52, %v1462_v51 }
 0x4a1   :  { %v1846_v62 = vpop.eup %1845  ;;  %v1496_v63 = vadd.f32 %v1468_v60, %v1432_v56  ;;  %v1489_v0 = vmul.f32 0.6931472, %v1844_v58 }
 0x4a2   :  { %v1501_v2 = vsel %vm1437_vm2, %v2154_v10, %v1497_v59  ;;  %v1480_v4 = vmul.f32 0.6931472, %v1846_v62 }
 0x4a3   :  { %1847 = vtanh.f32 %v1501_v2  ;;  %v1500_v9 = vsel %vm1436_vm5, %v2156_v12, %v1496_v63  ;;  %v1495_v7 = vsel %vm1494_vm6, %v1492_v1, %v1489_v0 }
 0x4a4   :  { %1849 = vtanh.f32 %v1500_v9  ;;  %v1499_v11 = vadd.f32 %v1495_v7, %v1435_v61  ;;  %v1486_v13 = vsel %vm1485_vm7, %v1483_v6, %v1480_v4 }
 0x4a5   :  { %v1498_v5 = vadd.f32 %v1486_v13, %v1434_v3 }
 0x4a6   :  { %v1503_v14 = vsel %vm1439_vm8, %v2162_v17, %v1499_v11 }
 0x4a7   :  { %1851 = vtanh.f32 %v1503_v14  ;;  %v1502_v8 = vsel %vm1438_vm9, %v2164_v20, %v1498_v5 }
 0x4a8   :  { %1853 = vtanh.f32 %v1502_v8 }
 0x4ad   :  { %v1848_v15 = vpop.eup %1847 }
 0x4ae   :  { %v1850_v16 = vpop.eup %1849  ;;  %v1509_v18 = vmul.f32 %v1848_v15, %v2154_v10 }
 0x4af   :  { %v1508_v19 = vmul.f32 %v1850_v16, %v2156_v12 }
 0x4b0   :  { %1513 = vst.msk [vmem:[#allocation2 + $0x8] sm:$0xff] %vm762_vm14, %v1509_v18 }
 0x4b1   :  { %v1852_v22 = vpop.eup %1851  ;;  %1512 = vst.msk [vmem:[#allocation2] sm:$0xff] %vm762_vm14, %v1508_v19 }
 0x4b2   :  { %v1854_v24 = vpop.eup %1853  ;;  %v1511_v25 = vmul.f32 %v1852_v22, %v2162_v17 }
 0x4b3   :  { %v1510_v21 = vmul.f32 %v1854_v24, %v2164_v20 }
 0x4b4   :  { %1515 = vst.msk [vmem:[#allocation2 + $0x18] sm:$0xff] %vm762_vm14, %v1511_v25 }
 0x4b5   :  { %1514 = vst.msk [vmem:[#allocation2 + $0x10] sm:$0xff] %vm762_vm14, %v1510_v21 }
 0x4b6   :  { %1866 = shalt.err (!%p1863_p4)
}
 0x4b7   :  { %s1867_s15 = scalar_lea.hbm %s2216_s9, 512 }
 0x4b8   :  { %p1868_p5 = scmp.ne.s32.totalorder %s2216_s9, %s1867_s15  ;;  %p1871_p6 = scmp.lt.u32.totalorder %s1867_s15, %s2216_s9 }
 0x4ba   :  { %p1873_p7 = pnand %p1871_p6, %p1868_p5 }
 0x4bc   :  { %1876 = shalt.err (!%p1873_p7)
}
 0x4bd   :  { %s1883_s5 = smov 128   ;;  %s1884_s19 = smov 8  }
 0x4be   :  { %1527 = dma.vmem_to_hbm [thread:$0]  %s1522_s6, 512, %s2216_s9, [#allocation3], %s1883_s5, %s1883_s5, %s1884_s19  }
 0x4bf   :  { %1877 = dma.done.wait [#allocation3], 512  }
 0x4c0   :  { %1878 = vsyncadd [#allocation3], 4294966784 }
 0x4c1   :  { %1531 = vsyncpa [#allocation3], 1 }

</bundles_post_ra>
